<compile_context>
chip_gen: v6e
topology: v6e:2x2x1
jax: 0.10.0
libtpu: 0.0.40
codegen_flags: <defaults>
</compile_context>

<pallas_src>
import math

import jax
import jax.numpy as jnp
from jax.experimental import pallas as pl
from jax.experimental.pallas import tpu as pltpu

F_IN = 16
HIDDEN = 32
F_OUT = 16
EPS = 1e-6


def _linear_fm(w_ref, h, b_ref):
    # feature-major linear: (out, in) @ (in, TM) + (out, 1) -> (out, TM)
    return jnp.dot(w_ref[...], h, preferred_element_type=jnp.float32) + b_ref[...]


def _norm_fm(h, a_ref, g_ref):
    # Custom Norm over the feature axis (axis 0 in feature-major layout),
    # torch-style unbiased std (ddof=1), eps added to std.
    d = h.shape[0]
    avg = jnp.mean(h, axis=0, keepdims=True)
    var = jnp.sum((h - avg) ** 2, axis=0, keepdims=True) / (d - 1)
    std = jnp.sqrt(var) + EPS
    inv_std = pl.reciprocal(std, approx=False)  # approx=True trades ~1e-3 rel err for EUP slot
    return a_ref[...] * (h - avg) * inv_std + g_ref[...]


def feedforward_kernel(x_ref,
                       w1_ref, b1_ref, w2_ref, b2_ref,
                       w3_ref, b3_ref, w4_ref, b4_ref,
                       a1_ref, g1_ref, a2_ref, g2_ref,
                       a3_ref, g3_ref, a4_ref, g4_ref,
                       o_ref):
    x = x_ref[...].astype(jnp.float32)            # (F_IN, TM)

    # x_ = relu(lin1(x)); x_ = norm1(x_)
    h = jnp.maximum(_linear_fm(w1_ref, x, b1_ref), 0.0)
    h = _norm_fm(h, a1_ref, g1_ref)
    # x_ = x_ + relu(lin2(x_)); x_ = norm2(x_)   (drop1 = identity in eval)
    h = h + jnp.maximum(_linear_fm(w2_ref, h, b2_ref), 0.0)
    h = _norm_fm(h, a2_ref, g2_ref)
    # x_ = x_ + relu(lin3(x_)); x_ = norm3(x_)   (drop2 = identity in eval)
    h = h + jnp.maximum(_linear_fm(w3_ref, h, b3_ref), 0.0)
    h = _norm_fm(h, a3_ref, g3_ref)
    # x_ = relu(lin4(x_)); out = norm4(x_)       (drop3 = identity in eval)
    h = jnp.maximum(_linear_fm(w4_ref, h, b4_ref), 0.0)
    h = _norm_fm(h, a4_ref, g4_ref)

    o_ref[...] = h.astype(o_ref.dtype)            # (F_OUT, TM)


def feedforward(x, params, *, max_tile=1024):
    """x: (..., F_IN) float32. Returns (..., F_OUT)."""
    lead_shape = x.shape[:-1]
    n_tokens = math.prod(lead_shape) if lead_shape else 1
    x2d = x.reshape(n_tokens, F_IN)

    # Token tile: multiple of 128 (lane axis in the feature-major layout), capped.
    tm = min(max_tile, ((n_tokens + 127) // 128) * 128)
    n_pad = ((n_tokens + tm - 1) // tm) * tm
    grid = (n_pad // tm,)

    # Pad tokens so every block is full, then flip to feature-major (F_IN, n_pad).
    x2d_p = jnp.pad(x2d, ((0, n_pad - n_tokens), (0, 0)))
    xt = x2d_p.T

    (w1, b1, w2, b2, w3, b3, w4, b4,
     a1, g1, a2, g2, a3, g3, a4, g4) = params
    param_ops = (w1, b1, w2, b2, w3, b3, w4, b4,
                 a1, g1, a2, g2, a3, g3, a4, g4)

    def const_spec(arr):
        # Full-array block, constant index map: DMA'd once, VMEM-resident across the grid.
        return pl.BlockSpec(arr.shape, lambda i: (0, 0))

    in_specs = ([pl.BlockSpec((F_IN, tm), lambda i: (0, i))]
                + [const_spec(p) for p in param_ops])
    out_spec = pl.BlockSpec((F_OUT, tm), lambda i: (0, i))

    flops = 2 * n_pad * (F_IN * HIDDEN + 2 * HIDDEN * HIDDEN + HIDDEN * F_OUT)
    weight_bytes = sum(int(p.size) * p.dtype.itemsize for p in param_ops)
    cost = pl.CostEstimate(
        flops=flops,
        transcendentals=8 * n_pad,  # sqrt + reciprocal per norm, 4 norms
        bytes_accessed=n_pad * (F_IN + F_OUT) * 4 + weight_bytes,
    )

    out_t = pl.pallas_call(
        feedforward_kernel,
        out_shape=jax.ShapeDtypeStruct((F_OUT, n_pad), jnp.float32),
        grid=grid,
        in_specs=in_specs,
        out_specs=out_spec,
        compiler_params=pltpu.CompilerParams(
            dimension_semantics=("parallel",)),
        cost_estimate=cost,
    )(xt, *param_ops)

    return out_t[:, :n_tokens].T.reshape(*lead_shape, F_OUT)


def init_params(key):
    """Deterministic params in the kernel's layout.

    Linear weights in torch-native (out, in); biases (out, 1).
    Norm(axis=-1) params alpha/bias stored as (d, 1) columns (broadcast over tokens).
    Values are randomized (learnable params) to exercise broadcasting paths.
    """
    ks = jax.random.split(key, 16)

    def lin(kw, kb, fi, fo):
        bound = 1.0 / jnp.sqrt(fi)
        w = jax.random.uniform(kw, (fo, fi), jnp.float32, -bound, bound)
        b = jax.random.uniform(kb, (fo, 1), jnp.float32, -bound, bound)
        return w, b

    w1, b1 = lin(ks[0], ks[1], F_IN, HIDDEN)
    w2, b2 = lin(ks[2], ks[3], HIDDEN, HIDDEN)
    w3, b3 = lin(ks[4], ks[5], HIDDEN, HIDDEN)
    w4, b4 = lin(ks[6], ks[7], HIDDEN, F_OUT)

    def norm_params(ka, kg, d):
        alpha = 1.0 + 0.1 * jax.random.normal(ka, (d, 1), jnp.float32)
        bias = 0.1 * jax.random.normal(kg, (d, 1), jnp.float32)
        return alpha, bias

    a1, g1 = norm_params(ks[8], ks[9], HIDDEN)
    a2, g2 = norm_params(ks[10], ks[11], HIDDEN)
    a3, g3 = norm_params(ks[12], ks[13], HIDDEN)
    a4, g4 = norm_params(ks[14], ks[15], F_OUT)

    return (w1, b1, w2, b2, w3, b3, w4, b4,
            a1, g1, a2, g2, a3, g3, a4, g4)


def feedforward_ref(x2d, params):
    """Pure-JAX token-major reference of the PyTorch forward (useReLU=True, eval mode)."""
    (w1, b1, w2, b2, w3, b3, w4, b4,
     a1, g1, a2, g2, a3, g3, a4, g4) = params

    def lin(h, w, b):                 # w (out, in), b (out, 1)
        return h @ w.T + b[:, 0]

    def norm(h, a, g):                # a, g (d, 1)
        d = h.shape[-1]
        avg = jnp.mean(h, axis=-1, keepdims=True)
        var = jnp.sum((h - avg) ** 2, axis=-1, keepdims=True) / (d - 1)
        return a[:, 0] * (h - avg) / (jnp.sqrt(var) + EPS) + g[:, 0]

    h = jax.nn.relu(lin(x2d, w1, b1)); h = norm(h, a1, g1)
    h = h + jax.nn.relu(lin(h, w2, b2)); h = norm(h, a2, g2)
    h = h + jax.nn.relu(lin(h, w3, b3)); h = norm(h, a3, g3)
    h = jax.nn.relu(lin(h, w4, b4))
    return norm(h, a4, g4)


if __name__ == "__main__":
    key = jax.random.PRNGKey(0)
    k_param, k_x = jax.random.split(key)

    params = init_params(k_param)
    # small input: batch=2, seq=8, f_in=16  -> output (2, 8, 16)
    x = jax.random.normal(k_x, (2, 8, F_IN), jnp.float32)

    out = feedforward(x, params)
    out = jax.block_until_ready(out)

    ref = feedforward_ref(x.reshape(-1, F_IN), params).reshape(2, 8, F_OUT)
    assert out.shape == (2, 8, F_OUT)
    assert jnp.allclose(out, ref, atol=1e-4, rtol=1e-4), float(jnp.max(jnp.abs(out - ref)))

    print("KERNEL_OK")
</pallas_src>

<mosaic_0001>
module attributes {stable_mosaic.version = 11 : i64} {
  func.func @feedforward_kernel(%arg0: i32, %arg1: memref<16x128xf32, #tpu.memory_space<vmem>>, %arg2: memref<32x16xf32, #tpu.memory_space<vmem>>, %arg3: memref<32x1xf32, #tpu.memory_space<vmem>>, %arg4: memref<32x32xf32, #tpu.memory_space<vmem>>, %arg5: memref<32x1xf32, #tpu.memory_space<vmem>>, %arg6: memref<32x32xf32, #tpu.memory_space<vmem>>, %arg7: memref<32x1xf32, #tpu.memory_space<vmem>>, %arg8: memref<16x32xf32, #tpu.memory_space<vmem>>, %arg9: memref<16x1xf32, #tpu.memory_space<vmem>>, %arg10: memref<32x1xf32, #tpu.memory_space<vmem>>, %arg11: memref<32x1xf32, #tpu.memory_space<vmem>>, %arg12: memref<32x1xf32, #tpu.memory_space<vmem>>, %arg13: memref<32x1xf32, #tpu.memory_space<vmem>>, %arg14: memref<32x1xf32, #tpu.memory_space<vmem>>, %arg15: memref<32x1xf32, #tpu.memory_space<vmem>>, %arg16: memref<16x1xf32, #tpu.memory_space<vmem>>, %arg17: memref<16x1xf32, #tpu.memory_space<vmem>>, %arg18: memref<16x128xf32, #tpu.memory_space<vmem>>) attributes {dimension_semantics = [#tpu.dimension_semantics<parallel>], iteration_bounds = array<i64: 1>, scalar_prefetch = 0 : i64, scratch_operands = 0 : i64, tpu.core_type = #tpu.core_type<tc>, window_params = [{transform_indices = @transform_0, window_bounds = array<i64: 16, 128>}, {pipeline_mode = #tpu.pipeline_mode<synchronous>, transform_indices = @transform_1, window_bounds = array<i64: 32, 16>}, {pipeline_mode = #tpu.pipeline_mode<synchronous>, transform_indices = @transform_2, window_bounds = array<i64: 32, 1>}, {pipeline_mode = #tpu.pipeline_mode<synchronous>, transform_indices = @transform_3, window_bounds = array<i64: 32, 32>}, {pipeline_mode = #tpu.pipeline_mode<synchronous>, transform_indices = @transform_4, window_bounds = array<i64: 32, 1>}, {pipeline_mode = #tpu.pipeline_mode<synchronous>, transform_indices = @transform_5, window_bounds = array<i64: 32, 32>}, {pipeline_mode = #tpu.pipeline_mode<synchronous>, transform_indices = @transform_6, window_bounds = array<i64: 32, 1>}, {pipeline_mode = #tpu.pipeline_mode<synchronous>, transform_indices = @transform_7, window_bounds = array<i64: 16, 32>}, {pipeline_mode = #tpu.pipeline_mode<synchronous>, transform_indices = @transform_8, window_bounds = array<i64: 16, 1>}, {pipeline_mode = #tpu.pipeline_mode<synchronous>, transform_indices = @transform_9, window_bounds = array<i64: 32, 1>}, {pipeline_mode = #tpu.pipeline_mode<synchronous>, transform_indices = @transform_10, window_bounds = array<i64: 32, 1>}, {pipeline_mode = #tpu.pipeline_mode<synchronous>, transform_indices = @transform_11, window_bounds = array<i64: 32, 1>}, {pipeline_mode = #tpu.pipeline_mode<synchronous>, transform_indices = @transform_12, window_bounds = array<i64: 32, 1>}, {pipeline_mode = #tpu.pipeline_mode<synchronous>, transform_indices = @transform_13, window_bounds = array<i64: 32, 1>}, {pipeline_mode = #tpu.pipeline_mode<synchronous>, transform_indices = @transform_14, window_bounds = array<i64: 32, 1>}, {pipeline_mode = #tpu.pipeline_mode<synchronous>, transform_indices = @transform_15, window_bounds = array<i64: 16, 1>}, {pipeline_mode = #tpu.pipeline_mode<synchronous>, transform_indices = @transform_16, window_bounds = array<i64: 16, 1>}, {transform_indices = @transform_17, window_bounds = array<i64: 16, 128>}]} {
    %c0 = arith.constant 0 : index
    %c0_0 = arith.constant 0 : index
    %0 = vector.load %arg1[%c0, %c0_0] : memref<16x128xf32, #tpu.memory_space<vmem>>, vector<16x128xf32>
    %c0_1 = arith.constant 0 : index
    %c0_2 = arith.constant 0 : index
    %1 = vector.load %arg2[%c0_1, %c0_2] : memref<32x16xf32, #tpu.memory_space<vmem>>, vector<32x16xf32>
    %cst = arith.constant dense<0.000000e+00> : vector<32x128xf32>
    %2 = tpu.matmul %1, %0, %cst {dimension_numbers = #tpu.dot_dimension_numbers<[1], [0], [0], [1], [0, 0, 1, 1], [], []>} : vector<32x16xf32>, vector<16x128xf32>, vector<32x128xf32> -> vector<32x128xf32>
    %c0_3 = arith.constant 0 : index
    %c0_4 = arith.constant 0 : index
    %3 = vector.load %arg3[%c0_3, %c0_4] : memref<32x1xf32, #tpu.memory_space<vmem>>, vector<32x1xf32>
    %4 = vector.broadcast %3 : vector<32x1xf32> to vector<32x128xf32>
    %5 = arith.addf %2, %4 : vector<32x128xf32>
    %cst_5 = arith.constant 0.000000e+00 : f32
    %6 = vector.broadcast %cst_5 : f32 to vector<32x128xf32>
    %7 = arith.maximumf %5, %6 : vector<32x128xf32>
    %cst_6 = arith.constant dense<0.000000e+00> : vector<128xf32>
    %8 = vector.multi_reduction <add>, %7, %cst_6 [0] : vector<32x128xf32> to vector<128xf32>
    %9 = vector.shape_cast %8 : vector<128xf32> to vector<1x128xf32>
    %cst_7 = arith.constant 3.200000e+01 : f32
    %10 = vector.broadcast %cst_7 : f32 to vector<1x128xf32>
    %11 = arith.divf %9, %10 : vector<1x128xf32>
    %12 = vector.broadcast %11 : vector<1x128xf32> to vector<32x128xf32>
    %13 = arith.subf %7, %12 : vector<32x128xf32>
    %14 = arith.mulf %13, %13 : vector<32x128xf32>
    %cst_8 = arith.constant dense<0.000000e+00> : vector<128xf32>
    %15 = vector.multi_reduction <add>, %14, %cst_8 [0] : vector<32x128xf32> to vector<128xf32>
    %16 = vector.shape_cast %15 : vector<128xf32> to vector<1x128xf32>
    %cst_9 = arith.constant 3.100000e+01 : f32
    %17 = vector.broadcast %cst_9 : f32 to vector<1x128xf32>
    %18 = arith.divf %16, %17 : vector<1x128xf32>
    %19 = math.sqrt %18 : vector<1x128xf32>
    %cst_10 = arith.constant 9.99999997E-7 : f32
    %20 = vector.broadcast %cst_10 : f32 to vector<1x128xf32>
    %21 = arith.addf %19, %20 : vector<1x128xf32>
    %22 = tpu.reciprocal %21 : vector<1x128xf32> -> vector<1x128xf32>
    %c0_11 = arith.constant 0 : index
    %c0_12 = arith.constant 0 : index
    %23 = vector.load %arg10[%c0_11, %c0_12] : memref<32x1xf32, #tpu.memory_space<vmem>>, vector<32x1xf32>
    %24 = vector.broadcast %11 : vector<1x128xf32> to vector<32x128xf32>
    %25 = arith.subf %7, %24 : vector<32x128xf32>
    %26 = vector.broadcast %23 : vector<32x1xf32> to vector<32x128xf32>
    %27 = arith.mulf %26, %25 : vector<32x128xf32>
    %28 = vector.broadcast %22 : vector<1x128xf32> to vector<32x128xf32>
    %29 = arith.mulf %27, %28 : vector<32x128xf32>
    %c0_13 = arith.constant 0 : index
    %c0_14 = arith.constant 0 : index
    %30 = vector.load %arg11[%c0_13, %c0_14] : memref<32x1xf32, #tpu.memory_space<vmem>>, vector<32x1xf32>
    %31 = vector.broadcast %30 : vector<32x1xf32> to vector<32x128xf32>
    %32 = arith.addf %29, %31 : vector<32x128xf32>
    %c0_15 = arith.constant 0 : index
    %c0_16 = arith.constant 0 : index
    %33 = vector.load %arg4[%c0_15, %c0_16] : memref<32x32xf32, #tpu.memory_space<vmem>>, vector<32x32xf32>
    %cst_17 = arith.constant dense<0.000000e+00> : vector<32x128xf32>
    %34 = tpu.matmul %33, %32, %cst_17 {dimension_numbers = #tpu.dot_dimension_numbers<[1], [0], [0], [1], [0, 0, 1, 1], [], []>} : vector<32x32xf32>, vector<32x128xf32>, vector<32x128xf32> -> vector<32x128xf32>
    %c0_18 = arith.constant 0 : index
    %c0_19 = arith.constant 0 : index
    %35 = vector.load %arg5[%c0_18, %c0_19] : memref<32x1xf32, #tpu.memory_space<vmem>>, vector<32x1xf32>
    %36 = vector.broadcast %35 : vector<32x1xf32> to vector<32x128xf32>
    %37 = arith.addf %34, %36 : vector<32x128xf32>
    %cst_20 = arith.constant 0.000000e+00 : f32
    %38 = vector.broadcast %cst_20 : f32 to vector<32x128xf32>
    %39 = arith.maximumf %37, %38 : vector<32x128xf32>
    %40 = arith.addf %32, %39 : vector<32x128xf32>
    %cst_21 = arith.constant dense<0.000000e+00> : vector<128xf32>
    %41 = vector.multi_reduction <add>, %40, %cst_21 [0] : vector<32x128xf32> to vector<128xf32>
    %42 = vector.shape_cast %41 : vector<128xf32> to vector<1x128xf32>
    %cst_22 = arith.constant 3.200000e+01 : f32
    %43 = vector.broadcast %cst_22 : f32 to vector<1x128xf32>
    %44 = arith.divf %42, %43 : vector<1x128xf32>
    %45 = vector.broadcast %44 : vector<1x128xf32> to vector<32x128xf32>
    %46 = arith.subf %40, %45 : vector<32x128xf32>
    %47 = arith.mulf %46, %46 : vector<32x128xf32>
    %cst_23 = arith.constant dense<0.000000e+00> : vector<128xf32>
    %48 = vector.multi_reduction <add>, %47, %cst_23 [0] : vector<32x128xf32> to vector<128xf32>
    %49 = vector.shape_cast %48 : vector<128xf32> to vector<1x128xf32>
    %cst_24 = arith.constant 3.100000e+01 : f32
    %50 = vector.broadcast %cst_24 : f32 to vector<1x128xf32>
    %51 = arith.divf %49, %50 : vector<1x128xf32>
    %52 = math.sqrt %51 : vector<1x128xf32>
    %cst_25 = arith.constant 9.99999997E-7 : f32
    %53 = vector.broadcast %cst_25 : f32 to vector<1x128xf32>
    %54 = arith.addf %52, %53 : vector<1x128xf32>
    %55 = tpu.reciprocal %54 : vector<1x128xf32> -> vector<1x128xf32>
    %c0_26 = arith.constant 0 : index
    %c0_27 = arith.constant 0 : index
    %56 = vector.load %arg12[%c0_26, %c0_27] : memref<32x1xf32, #tpu.memory_space<vmem>>, vector<32x1xf32>
    %57 = vector.broadcast %44 : vector<1x128xf32> to vector<32x128xf32>
    %58 = arith.subf %40, %57 : vector<32x128xf32>
    %59 = vector.broadcast %56 : vector<32x1xf32> to vector<32x128xf32>
    %60 = arith.mulf %59, %58 : vector<32x128xf32>
    %61 = vector.broadcast %55 : vector<1x128xf32> to vector<32x128xf32>
    %62 = arith.mulf %60, %61 : vector<32x128xf32>
    %c0_28 = arith.constant 0 : index
    %c0_29 = arith.constant 0 : index
    %63 = vector.load %arg13[%c0_28, %c0_29] : memref<32x1xf32, #tpu.memory_space<vmem>>, vector<32x1xf32>
    %64 = vector.broadcast %63 : vector<32x1xf32> to vector<32x128xf32>
    %65 = arith.addf %62, %64 : vector<32x128xf32>
    %c0_30 = arith.constant 0 : index
    %c0_31 = arith.constant 0 : index
    %66 = vector.load %arg6[%c0_30, %c0_31] : memref<32x32xf32, #tpu.memory_space<vmem>>, vector<32x32xf32>
    %cst_32 = arith.constant dense<0.000000e+00> : vector<32x128xf32>
    %67 = tpu.matmul %66, %65, %cst_32 {dimension_numbers = #tpu.dot_dimension_numbers<[1], [0], [0], [1], [0, 0, 1, 1], [], []>} : vector<32x32xf32>, vector<32x128xf32>, vector<32x128xf32> -> vector<32x128xf32>
    %c0_33 = arith.constant 0 : index
    %c0_34 = arith.constant 0 : index
    %68 = vector.load %arg7[%c0_33, %c0_34] : memref<32x1xf32, #tpu.memory_space<vmem>>, vector<32x1xf32>
    %69 = vector.broadcast %68 : vector<32x1xf32> to vector<32x128xf32>
    %70 = arith.addf %67, %69 : vector<32x128xf32>
    %cst_35 = arith.constant 0.000000e+00 : f32
    %71 = vector.broadcast %cst_35 : f32 to vector<32x128xf32>
    %72 = arith.maximumf %70, %71 : vector<32x128xf32>
    %73 = arith.addf %65, %72 : vector<32x128xf32>
    %cst_36 = arith.constant dense<0.000000e+00> : vector<128xf32>
    %74 = vector.multi_reduction <add>, %73, %cst_36 [0] : vector<32x128xf32> to vector<128xf32>
    %75 = vector.shape_cast %74 : vector<128xf32> to vector<1x128xf32>
    %cst_37 = arith.constant 3.200000e+01 : f32
    %76 = vector.broadcast %cst_37 : f32 to vector<1x128xf32>
    %77 = arith.divf %75, %76 : vector<1x128xf32>
    %78 = vector.broadcast %77 : vector<1x128xf32> to vector<32x128xf32>
    %79 = arith.subf %73, %78 : vector<32x128xf32>
    %80 = arith.mulf %79, %79 : vector<32x128xf32>
    %cst_38 = arith.constant dense<0.000000e+00> : vector<128xf32>
    %81 = vector.multi_reduction <add>, %80, %cst_38 [0] : vector<32x128xf32> to vector<128xf32>
    %82 = vector.shape_cast %81 : vector<128xf32> to vector<1x128xf32>
    %cst_39 = arith.constant 3.100000e+01 : f32
    %83 = vector.broadcast %cst_39 : f32 to vector<1x128xf32>
    %84 = arith.divf %82, %83 : vector<1x128xf32>
    %85 = math.sqrt %84 : vector<1x128xf32>
    %cst_40 = arith.constant 9.99999997E-7 : f32
    %86 = vector.broadcast %cst_40 : f32 to vector<1x128xf32>
    %87 = arith.addf %85, %86 : vector<1x128xf32>
    %88 = tpu.reciprocal %87 : vector<1x128xf32> -> vector<1x128xf32>
    %c0_41 = arith.constant 0 : index
    %c0_42 = arith.constant 0 : index
    %89 = vector.load %arg14[%c0_41, %c0_42] : memref<32x1xf32, #tpu.memory_space<vmem>>, vector<32x1xf32>
    %90 = vector.broadcast %77 : vector<1x128xf32> to vector<32x128xf32>
    %91 = arith.subf %73, %90 : vector<32x128xf32>
    %92 = vector.broadcast %89 : vector<32x1xf32> to vector<32x128xf32>
    %93 = arith.mulf %92, %91 : vector<32x128xf32>
    %94 = vector.broadcast %88 : vector<1x128xf32> to vector<32x128xf32>
    %95 = arith.mulf %93, %94 : vector<32x128xf32>
    %c0_43 = arith.constant 0 : index
    %c0_44 = arith.constant 0 : index
    %96 = vector.load %arg15[%c0_43, %c0_44] : memref<32x1xf32, #tpu.memory_space<vmem>>, vector<32x1xf32>
    %97 = vector.broadcast %96 : vector<32x1xf32> to vector<32x128xf32>
    %98 = arith.addf %95, %97 : vector<32x128xf32>
    %c0_45 = arith.constant 0 : index
    %c0_46 = arith.constant 0 : index
    %99 = vector.load %arg8[%c0_45, %c0_46] : memref<16x32xf32, #tpu.memory_space<vmem>>, vector<16x32xf32>
    %cst_47 = arith.constant dense<0.000000e+00> : vector<16x128xf32>
    %100 = tpu.matmul %99, %98, %cst_47 {dimension_numbers = #tpu.dot_dimension_numbers<[1], [0], [0], [1], [0, 0, 1, 1], [], []>} : vector<16x32xf32>, vector<32x128xf32>, vector<16x128xf32> -> vector<16x128xf32>
    %c0_48 = arith.constant 0 : index
    %c0_49 = arith.constant 0 : index
    %101 = vector.load %arg9[%c0_48, %c0_49] : memref<16x1xf32, #tpu.memory_space<vmem>>, vector<16x1xf32>
    %102 = vector.broadcast %101 : vector<16x1xf32> to vector<16x128xf32>
    %103 = arith.addf %100, %102 : vector<16x128xf32>
    %cst_50 = arith.constant 0.000000e+00 : f32
    %104 = vector.broadcast %cst_50 : f32 to vector<16x128xf32>
    %105 = arith.maximumf %103, %104 : vector<16x128xf32>
    %cst_51 = arith.constant dense<0.000000e+00> : vector<128xf32>
    %106 = vector.multi_reduction <add>, %105, %cst_51 [0] : vector<16x128xf32> to vector<128xf32>
    %107 = vector.shape_cast %106 : vector<128xf32> to vector<1x128xf32>
    %cst_52 = arith.constant 1.600000e+01 : f32
    %108 = vector.broadcast %cst_52 : f32 to vector<1x128xf32>
    %109 = arith.divf %107, %108 : vector<1x128xf32>
    %110 = vector.broadcast %109 : vector<1x128xf32> to vector<16x128xf32>
    %111 = arith.subf %105, %110 : vector<16x128xf32>
    %112 = arith.mulf %111, %111 : vector<16x128xf32>
    %cst_53 = arith.constant dense<0.000000e+00> : vector<128xf32>
    %113 = vector.multi_reduction <add>, %112, %cst_53 [0] : vector<16x128xf32> to vector<128xf32>
    %114 = vector.shape_cast %113 : vector<128xf32> to vector<1x128xf32>
    %cst_54 = arith.constant 1.500000e+01 : f32
    %115 = vector.broadcast %cst_54 : f32 to vector<1x128xf32>
    %116 = arith.divf %114, %115 : vector<1x128xf32>
    %117 = math.sqrt %116 : vector<1x128xf32>
    %cst_55 = arith.constant 9.99999997E-7 : f32
    %118 = vector.broadcast %cst_55 : f32 to vector<1x128xf32>
    %119 = arith.addf %117, %118 : vector<1x128xf32>
    %120 = tpu.reciprocal %119 : vector<1x128xf32> -> vector<1x128xf32>
    %c0_56 = arith.constant 0 : index
    %c0_57 = arith.constant 0 : index
    %121 = vector.load %arg16[%c0_56, %c0_57] : memref<16x1xf32, #tpu.memory_space<vmem>>, vector<16x1xf32>
    %122 = vector.broadcast %109 : vector<1x128xf32> to vector<16x128xf32>
    %123 = arith.subf %105, %122 : vector<16x128xf32>
    %124 = vector.broadcast %121 : vector<16x1xf32> to vector<16x128xf32>
    %125 = arith.mulf %124, %123 : vector<16x128xf32>
    %126 = vector.broadcast %120 : vector<1x128xf32> to vector<16x128xf32>
    %127 = arith.mulf %125, %126 : vector<16x128xf32>
    %c0_58 = arith.constant 0 : index
    %c0_59 = arith.constant 0 : index
    %128 = vector.load %arg17[%c0_58, %c0_59] : memref<16x1xf32, #tpu.memory_space<vmem>>, vector<16x1xf32>
    %129 = vector.broadcast %128 : vector<16x1xf32> to vector<16x128xf32>
    %130 = arith.addf %127, %129 : vector<16x128xf32>
    %c0_60 = arith.constant 0 : index
    %c0_61 = arith.constant 0 : index
    %131 = vector.load %arg18[%c0_60, %c0_61] : memref<16x128xf32, #tpu.memory_space<vmem>>, vector<16x128xf32>
    tpu.vector_store %arg18[%c0_60, %c0_61], %130 {strides = array<i32>} : memref<16x128xf32, #tpu.memory_space<vmem>>, vector<16x128xf32>,
    return
  }
  func.func @transform_0(%arg0: i32) -> (i32, i32) {
    %c0_i32 = arith.constant 0 : i32
    %c0_i32_0 = arith.constant 0 : i32
    return %c0_i32, %arg0 : i32, i32
  }
  func.func @transform_1(%arg0: i32) -> (i32, i32) {
    %c0_i32 = arith.constant 0 : i32
    %c0_i32_0 = arith.constant 0 : i32
    %c0_i32_1 = arith.constant 0 : i32
    return %c0_i32, %c0_i32_0 : i32, i32
  }
  func.func @transform_2(%arg0: i32) -> (i32, i32) {
    %c0_i32 = arith.constant 0 : i32
    %c0_i32_0 = arith.constant 0 : i32
    %c0_i32_1 = arith.constant 0 : i32
    return %c0_i32, %c0_i32_0 : i32, i32
  }
  func.func @transform_3(%arg0: i32) -> (i32, i32) {
    %c0_i32 = arith.constant 0 : i32
    %c0_i32_0 = arith.constant 0 : i32
    %c0_i32_1 = arith.constant 0 : i32
    return %c0_i32, %c0_i32_0 : i32, i32
  }
  func.func @transform_4(%arg0: i32) -> (i32, i32) {
    %c0_i32 = arith.constant 0 : i32
    %c0_i32_0 = arith.constant 0 : i32
    %c0_i32_1 = arith.constant 0 : i32
    return %c0_i32, %c0_i32_0 : i32, i32
  }
  func.func @transform_5(%arg0: i32) -> (i32, i32) {
    %c0_i32 = arith.constant 0 : i32
    %c0_i32_0 = arith.constant 0 : i32
    %c0_i32_1 = arith.constant 0 : i32
    return %c0_i32, %c0_i32_0 : i32, i32
  }
  func.func @transform_6(%arg0: i32) -> (i32, i32) {
    %c0_i32 = arith.constant 0 : i32
    %c0_i32_0 = arith.constant 0 : i32
    %c0_i32_1 = arith.constant 0 : i32
    return %c0_i32, %c0_i32_0 : i32, i32
  }
  func.func @transform_7(%arg0: i32) -> (i32, i32) {
    %c0_i32 = arith.constant 0 : i32
    %c0_i32_0 = arith.constant 0 : i32
    %c0_i32_1 = arith.constant 0 : i32
    return %c0_i32, %c0_i32_0 : i32, i32
  }
  func.func @transform_8(%arg0: i32) -> (i32, i32) {
    %c0_i32 = arith.constant 0 : i32
    %c0_i32_0 = arith.constant 0 : i32
    %c0_i32_1 = arith.constant 0 : i32
    return %c0_i32, %c0_i32_0 : i32, i32
  }
  func.func @transform_9(%arg0: i32) -> (i32, i32) {
    %c0_i32 = arith.constant 0 : i32
    %c0_i32_0 = arith.constant 0 : i32
    %c0_i32_1 = arith.constant 0 : i32
    return %c0_i32, %c0_i32_0 : i32, i32
  }
  func.func @transform_10(%arg0: i32) -> (i32, i32) {
    %c0_i32 = arith.constant 0 : i32
    %c0_i32_0 = arith.constant 0 : i32
    %c0_i32_1 = arith.constant 0 : i32
    return %c0_i32, %c0_i32_0 : i32, i32
  }
  func.func @transform_11(%arg0: i32) -> (i32, i32) {
    %c0_i32 = arith.constant 0 : i32
    %c0_i32_0 = arith.constant 0 : i32
    %c0_i32_1 = arith.constant 0 : i32
    return %c0_i32, %c0_i32_0 : i32, i32
  }
  func.func @transform_12(%arg0: i32) -> (i32, i32) {
    %c0_i32 = arith.constant 0 : i32
    %c0_i32_0 = arith.constant 0 : i32
    %c0_i32_1 = arith.constant 0 : i32
    return %c0_i32, %c0_i32_0 : i32, i32
  }
  func.func @transform_13(%arg0: i32) -> (i32, i32) {
    %c0_i32 = arith.constant 0 : i32
    %c0_i32_0 = arith.constant 0 : i32
    %c0_i32_1 = arith.constant 0 : i32
    return %c0_i32, %c0_i32_0 : i32, i32
  }
  func.func @transform_14(%arg0: i32) -> (i32, i32) {
    %c0_i32 = arith.constant 0 : i32
    %c0_i32_0 = arith.constant 0 : i32
    %c0_i32_1 = arith.constant 0 : i32
    return %c0_i32, %c0_i32_0 : i32, i32
  }
  func.func @transform_15(%arg0: i32) -> (i32, i32) {
    %c0_i32 = arith.constant 0 : i32
    %c0_i32_0 = arith.constant 0 : i32
    %c0_i32_1 = arith.constant 0 : i32
    return %c0_i32, %c0_i32_0 : i32, i32
  }
  func.func @transform_16(%arg0: i32) -> (i32, i32) {
    %c0_i32 = arith.constant 0 : i32
    %c0_i32_0 = arith.constant 0 : i32
    %c0_i32_1 = arith.constant 0 : i32
    return %c0_i32, %c0_i32_0 : i32, i32
  }
  func.func @transform_17(%arg0: i32) -> (i32, i32) {
    %c0_i32 = arith.constant 0 : i32
    %c0_i32_0 = arith.constant 0 : i32
    return %c0_i32, %arg0 : i32, i32
  }
}

</mosaic_0001>

<bundles_post_ra>
// kernel: tpu_custom_call.1
= control target key start
LH: loop header
LB: loop body
LE: loop exit
PB: predicated region body
PF: predicated region fallthrough
CT: control target
= control target key end

     0   :  { %s1345_s0 = inlined_call_operand.vmem [shape: f32[16,128], index: 0, kind: input, shape index: {}]   ;;  %s1346_s1 = inlined_call_operand.vmem [shape: f32[32,16], index: 1, kind: input, shape index: {}]   ;;  %s1347_s2 = inlined_call_operand.vmem [shape: f32[32,1], index: 2, kind: input, shape index: {}]   ;;  %s1348_s3 = inlined_call_operand.vmem [shape: f32[32,32], index: 3, kind: input, shape index: {}]   ;;  %s1349_s4 = inlined_call_operand.vmem [shape: f32[32,1], index: 4, kind: input, shape index: {}]   ;;  %s1350_s5 = inlined_call_operand.vmem [shape: f32[32,32], index: 5, kind: input, shape index: {}]   ;;  %s1351_s6 = inlined_call_operand.vmem [shape: f32[32,1], index: 6, kind: input, shape index: {}]   ;;  %s1352_s7 = inlined_call_operand.vmem [shape: f32[16,32], index: 7, kind: input, shape index: {}]   ;;  %s1353_s8 = inlined_call_operand.vmem [shape: f32[16,1], index: 8, kind: input, shape index: {}]   ;;  %s1354_s9 = inlined_call_operand.vmem [shape: f32[32,1], index: 9, kind: input, shape index: {}]   ;;  %s1355_s10 = inlined_call_operand.vmem [shape: f32[32,1], index: 10, kind: input, shape index: {}]   ;;  %s1356_s11 = inlined_call_operand.vmem [shape: f32[32,1], index: 11, kind: input, shape index: {}]   ;;  %s1357_s12 = inlined_call_operand.vmem [shape: f32[32,1], index: 12, kind: input, shape index: {}]   ;;  %s1358_s13 = inlined_call_operand.vmem [shape: f32[32,1], index: 13, kind: input, shape index: {}]   ;;  %s1359_s14 = inlined_call_operand.vmem [shape: f32[32,1], index: 14, kind: input, shape index: {}]   ;;  %s1360_s15 = inlined_call_operand.vmem [shape: f32[16,1], index: 15, kind: input, shape index: {}]   ;;  %s1361_s16 = inlined_call_operand.vmem [shape: f32[16,1], index: 16, kind: input, shape index: {}]   ;;  %s1362_s17 = inlined_call_operand.hbm [shape: f32[16,128], index: 17, kind: output, shape index: {}]  }
   0x1   :  { %1365 = sst [smem:[#allocation5_spill]] %s1345_s0 }
   0x2   :  { %1366 = sst [smem:[#allocation6_spill]] %s1346_s1 }
   0x3   :  { %s1367_s26 = sld [smem:[#allocation5_spill]]  ;;  %v65_v1 = vld [vmem:[%s1347_s2 + $0x10] sm:$0xff]  ;;  %v63_v2 = vld [vmem:[%s1347_s2] sm:$0xff]  ;;  %v1060_v3 = vmov 0   ;;  %vm87_vm0 = vcmask 130048   ;;  %v66_v7 = vld [vmem:[%s1347_s2 + $0x18] sm:$0xff] }
   0x4   :  { %1021 = vset.pattern.permute.xlu1 %v1060_v3  ;;  %1020 = vset.pattern.permute.xlu0 %v1060_v3  ;;  %s1368_s20 = sld [smem:[#allocation6_spill]]  ;;  %v64_v8 = vld [vmem:[%s1347_s2 + $0x8] sm:$0xff]  ;;  %v230_v11 = vld [vmem:[%s1354_s9 + $0x10] sm:$0xff]  ;;  %v231_v12 = vld [vmem:[%s1354_s9 + $0x18] sm:$0xff] }
   0x5   :  { %79 = vperm.xlu1 %1021, %v65_v1   ;;  %69 = vperm.xlu0 %1020, %v63_v2   ;;  %v263_v13 = vld [vmem:[%s1355_s10 + $0x18] sm:$0xff]  ;;  %v229_v14 = vld [vmem:[%s1354_s9 + $0x8] sm:$0xff]  ;;  %v262_v15 = vld [vmem:[%s1355_s10 + $0x10] sm:$0xff] }
   0x6   :  { %v228_v16 = vld [vmem:[%s1354_s9] sm:$0xff] }
   0x9   :  { %v58_v0 = vld [vmem:[%s1367_s26 + $0x8] sm:$0xff]  ;;  %v57_v4 = vld [vmem:[%s1367_s26] sm:$0xff]  ;;  %84 = vperm.xlu1 %1021, %v66_v7   ;;  %74 = vperm.xlu0 %1020, %v64_v8  }
   0xa   :  { %v59_v5 = vld [vmem:[%s1368_s20] sm:$0xff]  ;;  %967 = vmatprep.subr.mxu0 %v58_v0  ;;  %v60_v6 = vld [vmem:[%s1368_s20 + $0x8] sm:$0xff]  ;;  %v61_v9 = vld [vmem:[%s1368_s20 + $0x10] sm:$0xff] }
   0xb   :  { %968 = vmatpush3.msra.mxu0 %v58_v0  ;;  %971 = vmatprep.mubr.msk.f32.mxu0 %vm87_vm0, %v59_v5  ;;  %v62_v10 = vld [vmem:[%s1368_s20 + $0x18] sm:$0xff] }
   0xc   :  { %969 = vmatprep.subr.mxu0 %v57_v4 }
   0xd   :  { %970 = vmatpush3.msra.mxu0 %v57_v4  ;;  %244 = vperm.xlu1 %1021, %v230_v11  }
   0xe   :  { %972 = vmatmul.mubr.msk.f32.vlgmr.msra.gmra.mxu0 %vm87_vm0, %v60_v6  ;;  %249 = vperm.xlu0 %1020, %v231_v12  }
   0xf   :  { %974 = vmatprep.mubr.msk.f32.mxu0 %vm87_vm0, %v61_v9 }
  0x11   :  { %281 = vperm.xlu1 %1021, %v263_v13  }
  0x12   :  { %975 = vmatmul.mubr.msk.f32.gmra.mxu0 %vm87_vm0, %v62_v10  ;;  %239 = vperm.xlu0 %1020, %v229_v14  }
  0x13   :  { %22 = vsyncpa [#allocation3], 0  ;;  %v260_v17 = vld [vmem:[%s1355_s10] sm:$0xff]  ;;  %v261_v18 = vld [vmem:[%s1355_s10 + $0x8] sm:$0xff]  ;;  %vm316_vm1 = vcmask 261120  }
  0x14   :  { %v293_v19 = vld [vmem:[%s1349_s4 + $0x8] sm:$0xff]  ;;  %v292_v20 = vld [vmem:[%s1349_s4] sm:$0xff]  ;;  %v295_v21 = vld [vmem:[%s1349_s4 + $0x18] sm:$0xff] }
  0x15   :  { %276 = vperm.xlu1 %1021, %v262_v15   ;;  %v294_v22 = vld [vmem:[%s1349_s4 + $0x10] sm:$0xff]  ;;  %v462_v24 = vld [vmem:[%s1356_s11 + $0x18] sm:$0xff]  ;;  %v460_v26 = vld [vmem:[%s1356_s11 + $0x8] sm:$0xff] }
  0x16   :  { %234 = vperm.xlu0 %1020, %v228_v16   ;;  %v461_v23 = vld [vmem:[%s1356_s11 + $0x10] sm:$0xff]  ;;  %v494_v25 = vld [vmem:[%s1357_s12 + $0x18] sm:$0xff]  ;;  %v459_v28 = vld [vmem:[%s1356_s11] sm:$0xff] }
  0x17   :  { %v493_v27 = vld [vmem:[%s1357_s12 + $0x10] sm:$0xff]  ;;  %v491_v29 = vld [vmem:[%s1357_s12] sm:$0xff]  ;;  %v492_v30 = vld [vmem:[%s1357_s12 + $0x8] sm:$0xff] }
  0x18   :  { %v524_v31 = vld [vmem:[%s1351_s6 + $0x8] sm:$0xff]  ;;  %v523_v32 = vld [vmem:[%s1351_s6] sm:$0xff]  ;;  %v526_v33 = vld [vmem:[%s1351_s6 + $0x18] sm:$0xff] }
  0x19   :  { %266 = vperm.xlu1 %1021, %v260_v17   ;;  %v525_v34 = vld [vmem:[%s1351_s6 + $0x10] sm:$0xff]  ;;  %v692_v36 = vld [vmem:[%s1358_s13 + $0x18] sm:$0xff]  ;;  %v690_v38 = vld [vmem:[%s1358_s13 + $0x8] sm:$0xff] }
  0x1a   :  { %271 = vperm.xlu0 %1020, %v261_v18   ;;  %v691_v35 = vld [vmem:[%s1358_s13 + $0x10] sm:$0xff]  ;;  %v724_v37 = vld [vmem:[%s1359_s14 + $0x18] sm:$0xff]  ;;  %v689_v40 = vld [vmem:[%s1358_s13] sm:$0xff] }
  0x1b   :  { %v723_v39 = vld [vmem:[%s1359_s14 + $0x10] sm:$0xff]  ;;  %v721_v41 = vld [vmem:[%s1359_s14] sm:$0xff]  ;;  %v722_v42 = vld [vmem:[%s1359_s14 + $0x8] sm:$0xff] }
  0x1c   :  { %v752_v43 = vld [vmem:[%s1353_s8 + $0x8] sm:$0xff]  ;;  %v751_v44 = vld [vmem:[%s1353_s8] sm:$0xff] }
  0x1d   :  { %303 = vperm.xlu1 %1021, %v293_v19   ;;  %v878_v45 = vld [vmem:[%s1360_s15 + $0x8] sm:$0xff]  ;;  %v877_v46 = vld [vmem:[%s1360_s15] sm:$0xff] }
  0x1e   :  { %298 = vperm.xlu0 %1020, %v292_v20   ;;  %v894_v47 = vld [vmem:[%s1361_s16 + $0x8] sm:$0xff]  ;;  %v893_v48 = vld [vmem:[%s1361_s16] sm:$0xff] }
  0x1f   :  { %v288_v49 = vld [vmem:[%s1348_s3] sm:$0xff] }
  0x20   :  { %985 = vmatprep.mubr.msk.f32.mxu1 %vm316_vm1, %v288_v49 }
  0x21   :  { %313 = vperm.xlu1 %1021, %v295_v21  }
  0x22   :  { %308 = vperm.xlu0 %1020, %v294_v22  }
  0x25   :  { %475 = vperm.xlu1 %1021, %v461_v23  }
  0x26   :  { %480 = vperm.xlu0 %1020, %v462_v24  }
  0x29   :  { %512 = vperm.xlu1 %1021, %v494_v25  }
  0x2a   :  { %470 = vperm.xlu0 %1020, %v460_v26  }
  0x2d   :  { %507 = vperm.xlu1 %1021, %v493_v27  }
  0x2e   :  { %465 = vperm.xlu0 %1020, %v459_v28  }
  0x31   :  { %497 = vperm.xlu1 %1021, %v491_v29  }
  0x32   :  { %502 = vperm.xlu0 %1020, %v492_v30  }
  0x35   :  { %534 = vperm.xlu1 %1021, %v524_v31  }
  0x36   :  { %529 = vperm.xlu0 %1020, %v523_v32  }
  0x39   :  { %544 = vperm.xlu1 %1021, %v526_v33  }
  0x3a   :  { %539 = vperm.xlu0 %1020, %v525_v34  }
  0x3d   :  { %705 = vperm.xlu1 %1021, %v691_v35  }
  0x3e   :  { %710 = vperm.xlu0 %1020, %v692_v36  }
  0x41   :  { %742 = vperm.xlu1 %1021, %v724_v37  }
  0x42   :  { %700 = vperm.xlu0 %1020, %v690_v38  }
  0x45   :  { %737 = vperm.xlu1 %1021, %v723_v39  }
  0x46   :  { %695 = vperm.xlu0 %1020, %v689_v40  }
  0x49   :  { %727 = vperm.xlu1 %1021, %v721_v41  }
  0x4a   :  { %732 = vperm.xlu0 %1020, %v722_v42  }
  0x4d   :  { %760 = vperm.xlu1 %1021, %v752_v43  }
  0x4e   :  { %755 = vperm.xlu0 %1020, %v751_v44  }
  0x51   :  { %886 = vperm.xlu1 %1021, %v878_v45  }
  0x52   :  { %881 = vperm.xlu0 %1020, %v877_v46  }
  0x55   :  { %902 = vperm.xlu1 %1021, %v894_v47  }
  0x56   :  { %897 = vperm.xlu0 %1020, %v893_v48  }
  0x80   :  { %v70_v50 = vpop.permute.xlu0 %69  ;;  %v80_v51 = vpop.permute.xlu1 %79 }
  0x84   :  { %v75_v53 = vpop.permute.xlu0 %74  ;;  %v85_v59 = vpop.permute.xlu1 %84 }
  0x88   :  { %v245_v37 = vpop.permute.xlu1 %244 }
  0x89   :  { %v250_v36 = vpop.permute.xlu0 %249 }
  0x8c   :  { %v282_v39 = vpop.permute.xlu1 %281 }
  0x8d   :  { %v240_v38 = vpop.permute.xlu0 %239 }
  0x90   :  { %v277_v47 = vpop.permute.xlu1 %276 }
  0x91   :  { %v235_v43 = vpop.permute.xlu0 %234 }
  0xce   :  { %v973_v52 = vpop.f32.mrf.mxu0 }
  0xcf   :  { %v172_v55 = vadd.f32 %v973_v52, %v75_v53  ;;  %v272_v53 = vpop.permute.xlu0 %271 }
  0xd0   :  { %v166_v54 = vpop.f32.mrf.mxu0 }
  0xd1   :  { %v167_v56 = vadd.f32 %v166_v54, %v70_v50  ;;  %v186_v61 = vmax.f32 %v172_v55, 0.0  ;;  %v267_v55 = vpop.permute.xlu1 %266 }
  0xd2   :  { %v976_v57 = vpop.f32.mrf.mxu0 }
  0xd3   :  { %v185_v58 = vmax.f32 %v167_v56, 0.0  ;;  %v182_v62 = vadd.f32 %v976_v57, %v85_v59  ;;  %v289_v57 = vld [vmem:[%s1348_s3 + $0x8] sm:$0xff]  ;;  %v291_v59 = vld [vmem:[%s1348_s3 + $0x18] sm:$0xff] }
  0xd4   :  { %v176_v60 = vpop.f32.mrf.mxu0 }
  0xd5   :  { %v177_v63 = vadd.f32 %v176_v60, %v80_v51  ;;  %v189_v0 = vadd.f32 %v186_v61, %v185_v58  ;;  %v188_v2 = vmax.f32 %v182_v62, 0.0  ;;  %v519_v60 = vld [vmem:[%s1350_s5] sm:$0xff]  ;;  %v299_v62 = vpop.permute.xlu0 %298 }
  0xd6   :  { %999 = vmatprep.mubr.msk.f32.mxu0 %vm316_vm1, %v519_v60 }
  0xd7   :  { %v187_v1 = vmax.f32 %v177_v63, 0.0 }
  0xd9   :  { %v190_v3 = vadd.f32 %v189_v0, %v187_v1 }
  0xdb   :  { %v191_v4 = vadd.f32 %v190_v3, %v188_v2 }
  0xdd   :  { %v192_v5 = vrot.slane %v191_v4, 4 }
  0xdf   :  { %v193_v6 = vadd.f32 %v192_v5, %v191_v4 }
  0xe1   :  { %v194_v7 = vrot.slane %v193_v6, 2 }
  0xe3   :  { %v195_v8 = vadd.f32 %v194_v7, %v193_v6 }
  0xe5   :  { %v196_v9 = vrot.slane %v195_v8, 1 }
  0xe7   :  { %v197_v10 = vadd.f32 %v196_v9, %v195_v8  ;;  %v309_v8 = vpop.permute.xlu0 %308 }
  0xe9   :  { %v199_v11 = vmul.f32 0.03125, %v197_v10 }
  0xeb   :  { %v200_v12 = vsub.f32 %v185_v58, %v199_v11  ;;  %v201_v13 = vsub.f32 %v186_v61, %v199_v11  ;;  %v202_v14 = vsub.f32 %v187_v1, %v199_v11  ;;  %v203_v15 = vsub.f32 %v188_v2, %v199_v11  ;;  %v290_v58 = vld [vmem:[%s1348_s3 + $0x10] sm:$0xff]  ;;  %v304_v61 = vpop.permute.xlu1 %303 }
  0xed   :  { %v204_v16 = vmul.f32 %v200_v12, %v200_v12  ;;  %v205_v17 = vmul.f32 %v201_v13, %v201_v13  ;;  %v206_v18 = vmul.f32 %v202_v14, %v202_v14  ;;  %v207_v20 = vmul.f32 %v203_v15, %v203_v15 }
  0xee   :  { %v254_v40 = vmul.f32 %v245_v37, %v202_v14  ;;  %v255_v41 = vmul.f32 %v250_v36, %v203_v15  ;;  %v253_v46 = vmul.f32 %v240_v38, %v201_v13  ;;  %v252_v50 = vmul.f32 %v235_v43, %v200_v12 }
  0xef   :  { %v208_v19 = vadd.f32 %v205_v17, %v204_v16  ;;  %v314_v3 = vpop.permute.xlu1 %313 }
  0xf1   :  { %v209_v21 = vadd.f32 %v208_v19, %v206_v18 }
  0xf3   :  { %v210_v22 = vadd.f32 %v209_v21, %v207_v20 }
  0xf5   :  { %v211_v23 = vrot.slane %v210_v22, 4 }
  0xf7   :  { %v212_v24 = vadd.f32 %v211_v23, %v210_v22 }
  0xf9   :  { %v213_v25 = vrot.slane %v212_v24, 2 }
  0xfb   :  { %v214_v26 = vadd.f32 %v213_v25, %v212_v24 }
  0xfd   :  { %v215_v27 = vrot.slane %v214_v26, 1 }
  0xff   :  { %v216_v28 = vadd.f32 %v215_v27, %v214_v26 }
 0x101   :  { %v218_v29 = vmul.f32 0.032258064, %v216_v28 }
 0x103   :  { %1022 = vrsqrt.f32 %v218_v29  ;;  %vm221_vm2 = vcmp.eq.f32.partialorder %v218_v29, inf  ;;  %v224_v32 = vand.u32 2147483648, %v218_v29  ;;  %vm223_vm3 = vcmp.eq.f32.partialorder %v218_v29, 0.0 }
 0x110   :  { %v1023_v30 = vpop.eup %1022 }
 0x111   :  { %v220_v31 = vmul.f32 %v1023_v30, %v218_v29 }
 0x113   :  { %v222_v33 = vsel %vm221_vm2, %v218_v29, %v220_v31 }
 0x114   :  { %v225_v34 = vsel %vm223_vm3, %v224_v32, %v222_v33 }
 0x115   :  { %v226_v35 = vadd.f32 1e-06, %v225_v34 }
 0x117   :  { %1024 = vrcp.f32 %v226_v35 }
 0x124   :  { %v1025_v42 = vpop.eup %1024 }
 0x125   :  { %v259_v44 = vmul.f32 %v1025_v42, %v255_v41  ;;  %v258_v45 = vmul.f32 %v1025_v42, %v254_v40  ;;  %v257_v49 = vmul.f32 %v1025_v42, %v253_v46  ;;  %v256_v52 = vmul.f32 %v1025_v42, %v252_v50 }
 0x127   :  { %v287_v48 = vadd.f32 %v282_v39, %v259_v44  ;;  %v286_v51 = vadd.f32 %v277_v47, %v258_v45  ;;  %v285_v54 = vadd.f32 %v272_v53, %v257_v49  ;;  %v284_v56 = vadd.f32 %v267_v55, %v256_v52  ;;  %v476_v52 = vpop.permute.xlu1 %475 }
 0x129   :  { %977 = vmatprep.subr.mxu1 %v287_v48 }
 0x12a   :  { %978 = vmatpush3.msra.mxu1 %v287_v48 }
 0x12b   :  { %979 = vmatprep.subr.mxu1 %v286_v51 }
 0x12c   :  { %980 = vmatpush3.msra.mxu1 %v286_v51 }
 0x12d   :  { %981 = vmatprep.subr.mxu1 %v285_v54 }
 0x12e   :  { %982 = vmatpush3.msra.mxu1 %v285_v54 }
 0x12f   :  { %983 = vmatprep.subr.mxu1 %v284_v56 }
 0x130   :  { %984 = vmatpush3.msra.mxu1 %v284_v56 }
 0x131   :  { %986 = vmatmul.mubr.msk.f32.vlgmr.msra.gmra.mxu1 %vm316_vm1, %v289_v57 }
 0x132   :  { %988 = vmatprep.mubr.msk.f32.mxu1 %vm316_vm1, %v290_v58 }
 0x135   :  { %989 = vmatmul.mubr.msk.f32.gmra.mxu1 %vm316_vm1, %v291_v59 }
 0x1f1   :  { %v987_v63 = vpop.f32.mrf.mxu1 }
 0x1f2   :  { %v401_v0 = vadd.f32 %v987_v63, %v304_v61 }
 0x1f3   :  { %v395_v1 = vpop.f32.mrf.mxu1 }
 0x1f4   :  { %v396_v2 = vadd.f32 %v395_v1, %v299_v62  ;;  %v415_v5 = vmax.f32 %v401_v0, 0.0 }
 0x1f5   :  { %v990_v4 = vpop.f32.mrf.mxu1 }
 0x1f6   :  { %v414_v6 = vmax.f32 %v396_v2, 0.0  ;;  %v411_v7 = vadd.f32 %v990_v4, %v314_v3  ;;  %v419_v12 = vadd.f32 %v415_v5, %v285_v54  ;;  %v513_v54 = vpop.permute.xlu1 %512 }
 0x1f7   :  { %v405_v9 = vpop.f32.mrf.mxu1 }
 0x1f8   :  { %v418_v10 = vadd.f32 %v414_v6, %v284_v56  ;;  %v406_v11 = vadd.f32 %v405_v9, %v309_v8  ;;  %v417_v13 = vmax.f32 %v411_v7, 0.0  ;;  %v520_v8 = vld [vmem:[%s1350_s5 + $0x8] sm:$0xff]  ;;  %v521_v9 = vld [vmem:[%s1350_s5 + $0x10] sm:$0xff] }
 0x1fa   :  { %v416_v14 = vmax.f32 %v406_v11, 0.0  ;;  %v422_v15 = vadd.f32 %v419_v12, %v418_v10  ;;  %v421_v17 = vadd.f32 %v417_v13, %v287_v48  ;;  %v508_v62 = vpop.permute.xlu1 %507  ;;  %v749_v11 = vld [vmem:[%s1352_s7] sm:$0xff] }
 0x1fb   :  { %1013 = vmatprep.mubr.msk.f32.mxu1 %vm316_vm1, %v749_v11 }
 0x1fc   :  { %v420_v16 = vadd.f32 %v416_v14, %v286_v51  ;;  %v481_v51 = vpop.permute.xlu0 %480 }
 0x1fe   :  { %v423_v18 = vadd.f32 %v422_v15, %v420_v16  ;;  %v498_v6 = vpop.permute.xlu1 %497 }
 0x200   :  { %v424_v19 = vadd.f32 %v423_v18, %v421_v17  ;;  %v471_v53 = vpop.permute.xlu0 %470 }
 0x202   :  { %v425_v20 = vrot.slane %v424_v19, 4 }
 0x204   :  { %v426_v21 = vadd.f32 %v425_v20, %v424_v19  ;;  %v466_v58 = vpop.permute.xlu0 %465 }
 0x206   :  { %v427_v22 = vrot.slane %v426_v21, 2 }
 0x208   :  { %v428_v23 = vadd.f32 %v427_v22, %v426_v21  ;;  %v503_v4 = vpop.permute.xlu0 %502 }
 0x20a   :  { %v429_v24 = vrot.slane %v428_v23, 1 }
 0x20c   :  { %v430_v25 = vadd.f32 %v429_v24, %v428_v23  ;;  %v530_v13 = vpop.permute.xlu0 %529 }
 0x20e   :  { %v431_v26 = vmul.f32 0.03125, %v430_v25 }
 0x210   :  { %v432_v27 = vsub.f32 %v418_v10, %v431_v26  ;;  %v433_v28 = vsub.f32 %v419_v12, %v431_v26  ;;  %v434_v29 = vsub.f32 %v420_v16, %v431_v26  ;;  %v435_v32 = vsub.f32 %v421_v17, %v431_v26  ;;  %v522_v10 = vld [vmem:[%s1350_s5 + $0x18] sm:$0xff]  ;;  %v535_v12 = vpop.permute.xlu1 %534  ;;  %v540_v23 = vpop.permute.xlu0 %539 }
 0x212   :  { %v436_v30 = vmul.f32 %v432_v27, %v432_v27  ;;  %v437_v31 = vmul.f32 %v433_v28, %v433_v28  ;;  %v438_v33 = vmul.f32 %v434_v29, %v434_v29  ;;  %v439_v36 = vmul.f32 %v435_v32, %v435_v32 }
 0x213   :  { %v485_v55 = vmul.f32 %v476_v52, %v434_v29  ;;  %v486_v56 = vmul.f32 %v481_v51, %v435_v32  ;;  %v484_v61 = vmul.f32 %v471_v53, %v433_v28  ;;  %v483_v1 = vmul.f32 %v466_v58, %v432_v27 }
 0x214   :  { %v440_v34 = vadd.f32 %v437_v31, %v436_v30  ;;  %v545_v18 = vpop.permute.xlu1 %544 }
 0x216   :  { %v441_v35 = vadd.f32 %v440_v34, %v438_v33 }
 0x218   :  { %v442_v37 = vadd.f32 %v441_v35, %v439_v36 }
 0x21a   :  { %v443_v38 = vrot.slane %v442_v37, 4 }
 0x21c   :  { %v444_v39 = vadd.f32 %v443_v38, %v442_v37 }
 0x21e   :  { %v445_v40 = vrot.slane %v444_v39, 2 }
 0x220   :  { %v446_v41 = vadd.f32 %v445_v40, %v444_v39 }
 0x222   :  { %v447_v42 = vrot.slane %v446_v41, 1 }
 0x224   :  { %v448_v43 = vadd.f32 %v447_v42, %v446_v41 }
 0x226   :  { %v449_v44 = vmul.f32 0.032258064, %v448_v43 }
 0x228   :  { %1026 = vrsqrt.f32 %v449_v44  ;;  %vm452_vm4 = vcmp.eq.f32.partialorder %v449_v44, inf  ;;  %v455_v47 = vand.u32 2147483648, %v449_v44  ;;  %vm454_vm5 = vcmp.eq.f32.partialorder %v449_v44, 0.0 }
 0x235   :  { %v1027_v45 = vpop.eup %1026 }
 0x236   :  { %v451_v46 = vmul.f32 %v1027_v45, %v449_v44 }
 0x238   :  { %v453_v48 = vsel %vm452_vm4, %v449_v44, %v451_v46 }
 0x239   :  { %v456_v49 = vsel %vm454_vm5, %v455_v47, %v453_v48 }
 0x23a   :  { %v457_v50 = vadd.f32 1e-06, %v456_v49 }
 0x23c   :  { %1028 = vrcp.f32 %v457_v50 }
 0x249   :  { %v1029_v57 = vpop.eup %1028 }
 0x24a   :  { %v490_v59 = vmul.f32 %v1029_v57, %v486_v56  ;;  %v489_v60 = vmul.f32 %v1029_v57, %v485_v55  ;;  %v488_v0 = vmul.f32 %v1029_v57, %v484_v61  ;;  %v487_v3 = vmul.f32 %v1029_v57, %v483_v1 }
 0x24c   :  { %v518_v63 = vadd.f32 %v513_v54, %v490_v59  ;;  %v517_v2 = vadd.f32 %v508_v62, %v489_v60  ;;  %v516_v5 = vadd.f32 %v503_v4, %v488_v0  ;;  %v515_v7 = vadd.f32 %v498_v6, %v487_v3  ;;  %v706_v3 = vpop.permute.xlu1 %705 }
 0x24e   :  { %991 = vmatprep.subr.mxu0 %v518_v63 }
 0x24f   :  { %992 = vmatpush3.msra.mxu0 %v518_v63 }
 0x250   :  { %993 = vmatprep.subr.mxu0 %v517_v2 }
 0x251   :  { %994 = vmatpush3.msra.mxu0 %v517_v2 }
 0x252   :  { %995 = vmatprep.subr.mxu0 %v516_v5 }
 0x253   :  { %996 = vmatpush3.msra.mxu0 %v516_v5 }
 0x254   :  { %997 = vmatprep.subr.mxu0 %v515_v7 }
 0x255   :  { %998 = vmatpush3.msra.mxu0 %v515_v7 }
 0x256   :  { %1000 = vmatmul.mubr.msk.f32.vlgmr.msra.gmra.mxu0 %vm316_vm1, %v520_v8 }
 0x257   :  { %1002 = vmatprep.mubr.msk.f32.mxu0 %vm316_vm1, %v521_v9 }
 0x25a   :  { %1003 = vmatmul.mubr.msk.f32.gmra.mxu0 %vm316_vm1, %v522_v10 }
 0x316   :  { %v1001_v14 = vpop.f32.mrf.mxu0 }
 0x317   :  { %v631_v15 = vadd.f32 %v1001_v14, %v535_v12 }
 0x318   :  { %v625_v16 = vpop.f32.mrf.mxu0 }
 0x319   :  { %v626_v17 = vadd.f32 %v625_v16, %v530_v13  ;;  %v645_v20 = vmax.f32 %v631_v15, 0.0 }
 0x31a   :  { %v1004_v19 = vpop.f32.mrf.mxu0 }
 0x31b   :  { %v644_v21 = vmax.f32 %v626_v17, 0.0  ;;  %v641_v22 = vadd.f32 %v1004_v19, %v545_v18  ;;  %v649_v27 = vadd.f32 %v645_v20, %v516_v5  ;;  %v743_v5 = vpop.permute.xlu1 %742 }
 0x31c   :  { %v635_v24 = vpop.f32.mrf.mxu0 }
 0x31d   :  { %v648_v25 = vadd.f32 %v644_v21, %v515_v7  ;;  %v636_v26 = vadd.f32 %v635_v24, %v540_v23  ;;  %v647_v28 = vmax.f32 %v641_v22, 0.0  ;;  %v750_v23 = vld [vmem:[%s1352_s7 + $0x8] sm:$0xff]  ;;  %s1061_s7 = smov [#allocation2]  }
 0x31e   :  { %s914_s23 = sshll.u32 %s1061_s7, 4  ;;  %s915_s23 = int_to_ptr.vmem [resolvable:$true] %s914_s23 }
 0x31f   :  { %v646_v29 = vmax.f32 %v636_v26, 0.0  ;;  %v652_v30 = vadd.f32 %v649_v27, %v648_v25  ;;  %v651_v32 = vadd.f32 %v647_v28, %v518_v63  ;;  %v738_v13 = vpop.permute.xlu1 %737  ;;  %s1038_s13 = scalar_lea.vmem %s915_s23, 256  ;;  %p1043_p1 = scmp.lt.s32.totalorder %s915_s23, %s915_s23 }
 0x320   :  { %p1039_p0 = scmp.ne.s32.totalorder %s915_s23, %s1038_s13  ;;  %p1044_p2 = scmp.lt.s32.totalorder %s1038_s13, %s1038_s13 }
 0x321   :  { %v650_v31 = vadd.f32 %v646_v29, %v517_v2  ;;  %v711_v2 = vpop.permute.xlu0 %710 }
 0x322   :  { %p1045_p3 = por %p1044_p2, %p1043_p1 }
 0x323   :  { %v653_v33 = vadd.f32 %v652_v30, %v650_v31  ;;  %v728_v21 = vpop.permute.xlu1 %727 }
 0x324   :  { %p1046_p4 = pnand %p1045_p3, %p1039_p0 }
 0x325   :  { %v654_v34 = vadd.f32 %v653_v33, %v651_v32  ;;  %v701_v4 = vpop.permute.xlu0 %700 }
 0x327   :  { %v655_v35 = vrot.slane %v654_v34, 4  ;;  %v761_v24 = vpop.permute.xlu1 %760 }
 0x329   :  { %v656_v36 = vadd.f32 %v655_v35, %v654_v34  ;;  %v696_v9 = vpop.permute.xlu0 %695 }
 0x32b   :  { %v657_v37 = vrot.slane %v656_v36, 2 }
 0x32d   :  { %v658_v38 = vadd.f32 %v657_v37, %v656_v36  ;;  %v733_v19 = vpop.permute.xlu0 %732 }
 0x32f   :  { %v659_v39 = vrot.slane %v658_v38, 1 }
 0x331   :  { %v660_v40 = vadd.f32 %v659_v39, %v658_v38 }
 0x333   :  { %v661_v41 = vmul.f32 0.03125, %v660_v40 }
 0x335   :  { %v662_v42 = vsub.f32 %v648_v25, %v661_v41  ;;  %v663_v43 = vsub.f32 %v649_v27, %v661_v41  ;;  %v664_v44 = vsub.f32 %v650_v31, %v661_v41  ;;  %v665_v47 = vsub.f32 %v651_v32, %v661_v41  ;;  %v756_v27 = vpop.permute.xlu0 %755 }
 0x337   :  { %v666_v45 = vmul.f32 %v662_v42, %v662_v42  ;;  %v667_v46 = vmul.f32 %v663_v43, %v663_v43  ;;  %v668_v48 = vmul.f32 %v664_v44, %v664_v44  ;;  %v669_v51 = vmul.f32 %v665_v47, %v665_v47 }
 0x338   :  { %v715_v6 = vmul.f32 %v706_v3, %v664_v44  ;;  %v716_v7 = vmul.f32 %v711_v2, %v665_v47  ;;  %v714_v12 = vmul.f32 %v701_v4, %v663_v43  ;;  %v713_v16 = vmul.f32 %v696_v9, %v662_v42 }
 0x339   :  { %v670_v49 = vadd.f32 %v667_v46, %v666_v45 }
 0x33b   :  { %v671_v50 = vadd.f32 %v670_v49, %v668_v48 }
 0x33d   :  { %v672_v52 = vadd.f32 %v671_v50, %v669_v51 }
 0x33f   :  { %v673_v53 = vrot.slane %v672_v52, 4 }
 0x341   :  { %v674_v54 = vadd.f32 %v673_v53, %v672_v52 }
 0x343   :  { %v675_v55 = vrot.slane %v674_v54, 2 }
 0x345   :  { %v676_v56 = vadd.f32 %v675_v55, %v674_v54 }
 0x347   :  { %v677_v57 = vrot.slane %v676_v56, 1 }
 0x349   :  { %v678_v58 = vadd.f32 %v677_v57, %v676_v56 }
 0x34b   :  { %v679_v59 = vmul.f32 0.032258064, %v678_v58  ;;  %v887_v58 = vpop.permute.xlu1 %886 }
 0x34d   :  { %1030 = vrsqrt.f32 %v679_v59  ;;  %vm682_vm6 = vcmp.eq.f32.partialorder %v679_v59, inf  ;;  %v685_v62 = vand.u32 2147483648, %v679_v59  ;;  %vm684_vm7 = vcmp.eq.f32.partialorder %v679_v59, 0.0 }
 0x35a   :  { %v1031_v60 = vpop.eup %1030 }
 0x35b   :  { %v681_v61 = vmul.f32 %v1031_v60, %v679_v59 }
 0x35d   :  { %v683_v63 = vsel %vm682_vm6, %v679_v59, %v681_v61  ;;  %v882_v59 = vpop.permute.xlu0 %881 }
 0x35e   :  { %v686_v0 = vsel %vm684_vm7, %v685_v62, %v683_v63 }
 0x35f   :  { %v687_v1 = vadd.f32 1e-06, %v686_v0 }
 0x361   :  { %1032 = vrcp.f32 %v687_v1  ;;  %v903_v1 = vpop.permute.xlu1 %902  ;;  %v898_v2 = vpop.permute.xlu0 %897 }
 0x36e   :  { %v1033_v8 = vpop.eup %1032 }
 0x36f   :  { %v720_v10 = vmul.f32 %v1033_v8, %v716_v7  ;;  %v719_v11 = vmul.f32 %v1033_v8, %v715_v6  ;;  %v718_v15 = vmul.f32 %v1033_v8, %v714_v12  ;;  %v717_v18 = vmul.f32 %v1033_v8, %v713_v16 }
 0x371   :  { %v748_v14 = vadd.f32 %v743_v5, %v720_v10  ;;  %v747_v17 = vadd.f32 %v738_v13, %v719_v11  ;;  %v746_v20 = vadd.f32 %v733_v19, %v718_v15  ;;  %v745_v22 = vadd.f32 %v728_v21, %v717_v18 }
 0x373   :  { %1005 = vmatprep.subr.mxu1 %v748_v14 }
 0x374   :  { %1006 = vmatpush3.msra.mxu1 %v748_v14 }
 0x375   :  { %1007 = vmatprep.subr.mxu1 %v747_v17 }
 0x376   :  { %1008 = vmatpush3.msra.mxu1 %v747_v17 }
 0x377   :  { %1009 = vmatprep.subr.mxu1 %v746_v20 }
 0x378   :  { %1010 = vmatpush3.msra.mxu1 %v746_v20 }
 0x379   :  { %1011 = vmatprep.subr.mxu1 %v745_v22 }
 0x37a   :  { %1012 = vmatpush3.msra.mxu1 %v745_v22 }
 0x37b   :  { %1014 = vmatmul.mubr.msk.f32.vlgmr.msra.gmra.mxu1 %vm316_vm1, %v750_v23 }
 0x43b   :  { %v1015_v25 = vpop.f32.mrf.mxu1 }
 0x43c   :  { %v841_v26 = vadd.f32 %v1015_v25, %v761_v24 }
 0x43d   :  { %v835_v28 = vpop.f32.mrf.mxu1 }
 0x43e   :  { %v836_v29 = vadd.f32 %v835_v28, %v756_v27  ;;  %v845_v30 = vmax.f32 %v841_v26, 0.0 }
 0x440   :  { %v844_v31 = vmax.f32 %v836_v29, 0.0 }
 0x442   :  { %v846_v32 = vadd.f32 %v845_v30, %v844_v31 }
 0x444   :  { %v847_v33 = vrot.slane %v846_v32, 4 }
 0x446   :  { %v848_v34 = vadd.f32 %v847_v33, %v846_v32 }
 0x448   :  { %v849_v35 = vrot.slane %v848_v34, 2 }
 0x44a   :  { %v850_v36 = vadd.f32 %v849_v35, %v848_v34 }
 0x44c   :  { %v851_v37 = vrot.slane %v850_v36, 1 }
 0x44e   :  { %v852_v38 = vadd.f32 %v851_v37, %v850_v36 }
 0x450   :  { %v854_v39 = vmul.f32 0.0625, %v852_v38 }
 0x452   :  { %v855_v40 = vsub.f32 %v844_v31, %v854_v39  ;;  %v856_v41 = vsub.f32 %v845_v30, %v854_v39 }
 0x454   :  { %v857_v42 = vmul.f32 %v855_v40, %v855_v40  ;;  %v858_v43 = vmul.f32 %v856_v41, %v856_v41  ;;  %v889_v60 = vmul.f32 %v882_v59, %v855_v40  ;;  %v890_v61 = vmul.f32 %v887_v58, %v856_v41 }
 0x456   :  { %v859_v44 = vadd.f32 %v858_v43, %v857_v42 }
 0x458   :  { %v860_v45 = vrot.slane %v859_v44, 4 }
 0x45a   :  { %v861_v46 = vadd.f32 %v860_v45, %v859_v44 }
 0x45c   :  { %v862_v47 = vrot.slane %v861_v46, 2 }
 0x45e   :  { %v863_v48 = vadd.f32 %v862_v47, %v861_v46 }
 0x460   :  { %v864_v49 = vrot.slane %v863_v48, 1 }
 0x462   :  { %v865_v50 = vadd.f32 %v864_v49, %v863_v48 }
 0x464   :  { %v867_v51 = vmul.f32 0.06666667, %v865_v50 }
 0x466   :  { %1034 = vrsqrt.f32 %v867_v51  ;;  %vm870_vm8 = vcmp.eq.f32.partialorder %v867_v51, inf  ;;  %v873_v54 = vand.u32 2147483648, %v867_v51  ;;  %vm872_vm9 = vcmp.eq.f32.partialorder %v867_v51, 0.0 }
 0x473   :  { %v1035_v52 = vpop.eup %1034 }
 0x474   :  { %v869_v53 = vmul.f32 %v1035_v52, %v867_v51 }
 0x476   :  { %v871_v55 = vsel %vm870_vm8, %v867_v51, %v869_v53 }
 0x477   :  { %v874_v56 = vsel %vm872_vm9, %v873_v54, %v871_v55 }
 0x478   :  { %v875_v57 = vadd.f32 1e-06, %v874_v56 }
 0x47a   :  { %1036 = vrcp.f32 %v875_v57 }
 0x487   :  { %v1037_v62 = vpop.eup %1036 }
 0x488   :  { %v891_v63 = vmul.f32 %v1037_v62, %v889_v60  ;;  %v892_v0 = vmul.f32 %v1037_v62, %v890_v61 }
 0x48a   :  { %v905_v3 = vadd.f32 %v898_v2, %v891_v63  ;;  %v906_v4 = vadd.f32 %v903_v1, %v892_v0 }
 0x48c   :  { %907 = vst [vmem:[#allocation2] sm:$0xff] %v905_v3  ;;  %908 = vst [vmem:[#allocation2 + $0x8] sm:$0xff] %v906_v4 }
 0x48d   :  { %1049 = shalt.err (!%p1046_p4)
}
 0x48e   :  { %s1062_s20 = smov 128   ;;  %s1063_s24 = smov 8  }
 0x48f   :  { %920 = dma.vmem_to_hbm [thread:$0]  %s915_s23, 256, %s1362_s17, [#allocation3], %s1062_s20, %s1062_s20, %s1063_s24  }
 0x490   :  { %1058 = dma.done.wait [#allocation3], 256  }
 0x491   :  { %1059 = vsyncadd [#allocation3], 4294967040 }
 0x492   :  { %924 = vsyncpa [#allocation3], 1 }

</bundles_post_ra>
